<compile_context>
chip_gen: v7x
topology: tpu7x:2x2x1
jax: 0.10.0
libtpu: 0.0.40
codegen_flags: <defaults>
</compile_context>

<pallas_src>
import functools

import jax
import jax.numpy as jnp
from jax import lax
from jax.experimental import pallas as pl
from jax.experimental.pallas import tpu as pltpu

CONTEXT_SIZE = 32
INPUT_SIZE = 12          # 6 strings x (pitch, vel)
HIDDEN1 = 32             # linear1 output
HIDDEN_GRU = 64          # GRU hidden size
LN_EPS = 1e-5
LEAKY_SLOPE = 0.01       # nn.LeakyReLU default

_GATE_STRIDE = 128       # lane stride per gate (vreg aligned)
_UNROLL = 8              # recurrence unroll factor
_MAX_CHUNK_T = 512       # max timesteps per grid step
_VMEM_BUDGET = 12 << 20  # bytes for double-buffered in/out blocks (v5e-safe)


def _make_gru_kernel(chunk, rem):
    """Build the chunked GRU-recurrence kernel for a static (chunk, rem)."""
    H = HIDDEN_GRU
    GS = _GATE_STRIDE

    def kernel(gx_ref,        # (chunk, B, 3*GS) fused, gate-padded input gates
               whh_ref,       # (H, 3*GS)  [W_hr | pad | W_hz | pad | W_hn | pad]
               bhn_ref,       # (1, H)     hidden bias of the n-gate
               h_out_ref,     # (chunk, B, H) per-timestep hidden states
               h_ref):        # VMEM (B, H): hidden-state carry across chunks
        # Zero the hidden state only on the very first chunk of the sequence.
        @pl.when(pl.program_id(0) == 0)
        def _():
            h_ref[...] = jnp.zeros_like(h_ref)

        # Hoist weights out of the recurrence loop.
        whh = whh_ref[...]
        bhn = bhn_ref[...]

        def step(t, h):
            gx = gx_ref[t]                                            # (B, 3*GS)
            # Single fused hidden->gates matmul (r | z | n), 128-lane strided.
            gh = jnp.dot(h, whh, preferred_element_type=jnp.float32)  # (B, 3*GS)
            r = jax.nn.sigmoid(gx[:, 0:H] + gh[:, 0:H])
            z = jax.nn.sigmoid(gx[:, GS:GS + H] + gh[:, GS:GS + H])
            n = jnp.tanh(gx[:, 2 * GS:2 * GS + H]
                         + r * (gh[:, 2 * GS:2 * GS + H] + bhn))
            h_new = (1.0 - z) * n + z * h                             # (B, H)
            h_out_ref[t] = h_new        # store only; off the recurrence chain
            return h_new

        if rem == 0:
            h_ref[...] = lax.fori_loop(0, chunk, step, h_ref[...],
                                       unroll=min(_UNROLL, chunk))
        else:
            is_last = pl.program_id(0) == pl.num_programs(0) - 1

            @pl.when(jnp.logical_not(is_last))
            def _():
                h_ref[...] = lax.fori_loop(0, chunk, step, h_ref[...],
                                           unroll=min(_UNROLL, chunk))

            @pl.when(is_last)
            def _():
                # Tail chunk: statically-bounded loop over the true remainder,
                # so padded timesteps never run dead recurrence steps.
                h_ref[...] = lax.fori_loop(0, rem, step, h_ref[...],
                                           unroll=min(_UNROLL, rem))

    return kernel


def _choose_chunk(t_total, batch, max_chunk_t):
    """Largest chunk <= max_chunk_t that fits the double-buffered VMEM budget."""
    # double-buffered gates_x block + double-buffered h output block, f32.
    per_t_bytes = 4 * batch * 2 * (3 * _GATE_STRIDE + HIDDEN_GRU)
    cap = max(1, _VMEM_BUDGET // per_t_bytes)
    return int(max(1, min(t_total, max_chunk_t, cap)))


def init_params(key, input_size=INPUT_SIZE, context_size=CONTEXT_SIZE):
    """Deterministic synthetic parameters (PyTorch-style uniform fan-in init)."""
    ks = jax.random.split(key, 12)

    def unif(k, shape, fan_in):
        bound = 1.0 / jnp.sqrt(jnp.asarray(fan_in, jnp.float32))
        return jax.random.uniform(k, shape, jnp.float32, -bound, bound)

    H = HIDDEN_GRU
    p = {}
    # linear1: torch (out=32, in=12) -> stored transposed (in, out)
    p["w1"] = unif(ks[0], (input_size, HIDDEN1), input_size)
    p["b1"] = unif(ks[1], (1, HIDDEN1), input_size)
    # GRU weight_ih (3H, 32), weight_hh (3H, 64), biases (3H,) -> per-gate,
    # transposed to (in, H). PyTorch GRU inits everything with 1/sqrt(H).
    w_ih = unif(ks[2], (3 * H, HIDDEN1), H)
    w_hh = unif(ks[3], (3 * H, H), H)
    b_ih = unif(ks[4], (3 * H,), H)
    b_hh = unif(ks[5], (3 * H,), H)
    p["wir"], p["wiz"], p["win"] = (w_ih[0:H].T, w_ih[H:2 * H].T,
                                    w_ih[2 * H:3 * H].T)
    p["whr"], p["whz"], p["whn"] = (w_hh[0:H].T, w_hh[H:2 * H].T,
                                    w_hh[2 * H:3 * H].T)
    p["br"] = (b_ih[0:H] + b_hh[0:H]).reshape(1, H)
    p["bz"] = (b_ih[H:2 * H] + b_hh[H:2 * H]).reshape(1, H)
    p["bin"] = b_ih[2 * H:3 * H].reshape(1, H)
    p["bhn"] = b_hh[2 * H:3 * H].reshape(1, H)
    # LayerNorm
    p["gamma"] = jnp.ones((1, H), jnp.float32)
    p["beta"] = jnp.zeros((1, H), jnp.float32)
    # linear2: torch (out=context, in=64) -> transposed
    p["w2"] = unif(ks[6], (H, context_size), H)
    p["b2"] = unif(ks[7], (1, context_size), H)
    return p


@functools.partial(jax.jit, static_argnames=("max_chunk_t",))
def context_network_forward(conditioning, params, *, max_chunk_t=_MAX_CHUNK_T):
    """conditioning: (B, T, 6, 2) float32 -> context: (B, T, CONTEXT_SIZE)."""
    B, T, S, P = conditioning.shape
    H, GS = HIDDEN_GRU, _GATE_STRIDE

    # ---- time-major, time-parallel pre-pass (big XLA matmuls) ----
    # Transpose the narrow (B,T,12) input once; all wide intermediates are
    # produced time-major directly (no transpose of the (T,B,384) tensor).
    x = jnp.transpose(conditioning.reshape(B, T, S * P).astype(jnp.float32),
                      (1, 0, 2))                                    # (T, B, 12)
    a = x @ params["w1"] + params["b1"]
    a = jnp.where(a >= 0, a, LEAKY_SLOPE * a)                       # (T, B, 32)

    def pad_gate(w):  # (.., H) -> (.., GS): each gate starts at lane 0 of a vreg
        return jnp.pad(w, ((0, 0), (0, GS - H)))

    w_ih = jnp.concatenate([pad_gate(params["wir"]), pad_gate(params["wiz"]),
                            pad_gate(params["win"])], axis=1)       # (32, 3*GS)
    b_x = jnp.concatenate([pad_gate(params["br"]), pad_gate(params["bz"]),
                           pad_gate(params["bin"])], axis=1)        # (1, 3*GS)
    w_hh = jnp.concatenate([pad_gate(params["whr"]), pad_gate(params["whz"]),
                            pad_gate(params["whn"])], axis=1)       # (64, 3*GS)

    gates_x = a @ w_ih + b_x                                        # (T, B, 3*GS)

    # ---- chunked sequential Pallas kernel: GRU recurrence only ----
    chunk = _choose_chunk(T, B, max_chunk_t)
    num_chunks = -(-T // chunk)
    t_pad = num_chunks * chunk
    rem = T % chunk
    if t_pad != T:  # pad tail timesteps (their outputs are sliced off below)
        gates_x = jnp.pad(gates_x, ((0, t_pad - T), (0, 0), (0, 0)))

    h_tm = pl.pallas_call(
        _make_gru_kernel(chunk, rem),
        out_shape=jax.ShapeDtypeStruct((t_pad, B, H), jnp.float32),
        grid=(num_chunks,),
        in_specs=[
            pl.BlockSpec((chunk, B, 3 * GS), lambda i: (i, 0, 0)),
            pl.BlockSpec((H, 3 * GS), lambda i: (0, 0)),
            pl.BlockSpec((1, H), lambda i: (0, 0)),
        ],
        out_specs=pl.BlockSpec((chunk, B, H), lambda i: (i, 0, 0)),
        scratch_shapes=[pltpu.VMEM((B, H), jnp.float32)],
        compiler_params=pltpu.CompilerParams(
            dimension_semantics=("arbitrary",)),
    )(gates_x, w_hh, params["bhn"])

    # ---- hoisted LayerNorm + linear2 (time-parallel, one big XLA matmul) ----
    h_tm = h_tm[:T]                                                 # (T, B, H)
    mean = jnp.mean(h_tm, axis=-1, keepdims=True)
    var = jnp.mean(jnp.square(h_tm - mean), axis=-1, keepdims=True)
    y = (h_tm - mean) * lax.rsqrt(var + LN_EPS) * params["gamma"] + params["beta"]
    ctx = y @ params["w2"] + params["b2"]                           # (T, B, C)
    return jnp.transpose(ctx, (1, 0, 2))                            # (B, T, C)


def _reference_forward(conditioning, params):
    """Pure-JAX reference (mirrors the PyTorch forward) for validation."""
    B, T, S, P = conditioning.shape
    x = conditioning.reshape(B, T, S * P)
    a = x @ params["w1"] + params["b1"]
    a = jnp.where(a >= 0, a, LEAKY_SLOPE * a)

    def cell(h, xt):
        r = jax.nn.sigmoid(xt @ params["wir"] + h @ params["whr"] + params["br"])
        z = jax.nn.sigmoid(xt @ params["wiz"] + h @ params["whz"] + params["bz"])
        n = jnp.tanh(xt @ params["win"] + params["bin"]
                     + r * (h @ params["whn"] + params["bhn"]))
        h_new = (1.0 - z) * n + z * h
        return h_new, h_new

    h0 = jnp.zeros((B, HIDDEN_GRU), jnp.float32)
    _, hs = lax.scan(cell, h0, jnp.transpose(a, (1, 0, 2)))
    h = jnp.transpose(hs, (1, 0, 2))                                # (B, T, 64)

    mean = jnp.mean(h, axis=-1, keepdims=True)
    var = jnp.mean(jnp.square(h - mean), axis=-1, keepdims=True)
    y = (h - mean) * lax.rsqrt(var + LN_EPS) * params["gamma"] + params["beta"]
    return y @ params["w2"] + params["b2"]


if __name__ == "__main__":
    key = jax.random.PRNGKey(0)
    k_param, k_in1, k_in2 = jax.random.split(key, 3)

    params = init_params(k_param)

    # Small shape consistent with the module: (batch, frames, 6 strings, 2).
    batch, frames = 2, 8
    cond = jax.random.normal(k_in1, (batch, frames, 6, 2), jnp.float32)
    out = jax.block_until_ready(context_network_forward(cond, params))
    assert out.shape == (batch, frames, CONTEXT_SIZE), out.shape
    ref = _reference_forward(cond, params)
    assert jnp.allclose(out, ref, atol=1e-4, rtol=1e-4), (
        float(jnp.max(jnp.abs(out - ref))))

    # Exercise the multi-chunk hidden-state carry and the partial tail chunk
    # (small max_chunk_t forces grid=5, remainder=3) at small shapes.
    frames2 = 19
    cond2 = jax.random.normal(k_in2, (batch, frames2, 6, 2), jnp.float32)
    out2 = jax.block_until_ready(
        context_network_forward(cond2, params, max_chunk_t=4))
    assert out2.shape == (batch, frames2, CONTEXT_SIZE), out2.shape
    ref2 = _reference_forward(cond2, params)
    assert jnp.allclose(out2, ref2, atol=1e-4, rtol=1e-4), (
        float(jnp.max(jnp.abs(out2 - ref2))))

    print("KERNEL_OK")
</pallas_src>

<mosaic_0001>
module attributes {stable_mosaic.version = 11 : i64} {
  func.func @kernel(%arg0: i32, %arg1: memref<8x2x384xf32, #tpu.memory_space<vmem>>, %arg2: memref<64x384xf32, #tpu.memory_space<vmem>>, %arg3: memref<1x64xf32, #tpu.memory_space<vmem>>, %arg4: memref<8x2x64xf32, #tpu.memory_space<vmem>>, %arg5: memref<2x64xf32, #tpu.memory_space<vmem>>) attributes {dimension_semantics = [#tpu.dimension_semantics<arbitrary>], iteration_bounds = array<i64: 1>, scalar_prefetch = 0 : i64, scratch_operands = 1 : i64, tpu.core_type = #tpu.core_type<tc>, window_params = [{transform_indices = @transform_0, window_bounds = array<i64: 8, 2, 384>}, {pipeline_mode = #tpu.pipeline_mode<synchronous>, transform_indices = @transform_1, window_bounds = array<i64: 64, 384>}, {pipeline_mode = #tpu.pipeline_mode<synchronous>, transform_indices = @transform_2, window_bounds = array<i64: 1, 64>}, {transform_indices = @transform_3, window_bounds = array<i64: 8, 2, 64>}]} {
    %c0_i32 = arith.constant 0 : i32
    %0 = arith.cmpi eq, %arg0, %c0_i32 : i32
    %1 = arith.extui %0 : i1 to i32
    %c0_i32_0 = arith.constant 0 : i32
    %2 = arith.cmpi ne, %1, %c0_i32_0 : i32
    scf.if %2 {
      %cst_72 = arith.constant 0.000000e+00 : f32
      %295 = vector.broadcast %cst_72 : f32 to vector<2x64xf32>
      %c0_73 = arith.constant 0 : index
      %c0_74 = arith.constant 0 : index
      %296 = vector.load %arg5[%c0_73, %c0_74] : memref<2x64xf32, #tpu.memory_space<vmem>>, vector<2x64xf32>
      tpu.vector_store %arg5[%c0_73, %c0_74], %295 {strides = array<i32>} : memref<2x64xf32, #tpu.memory_space<vmem>>, vector<2x64xf32>,
    } else {
    }
    %c0 = arith.constant 0 : index
    %c0_1 = arith.constant 0 : index
    %3 = vector.load %arg2[%c0, %c0_1] : memref<64x384xf32, #tpu.memory_space<vmem>>, vector<64x384xf32>
    %c0_2 = arith.constant 0 : index
    %c0_3 = arith.constant 0 : index
    %4 = vector.load %arg3[%c0_2, %c0_3] : memref<1x64xf32, #tpu.memory_space<vmem>>, vector<1x64xf32>
    %c0_4 = arith.constant 0 : index
    %c0_5 = arith.constant 0 : index
    %5 = vector.load %arg5[%c0_4, %c0_5] : memref<2x64xf32, #tpu.memory_space<vmem>>, vector<2x64xf32>
    %c0_i32_6 = arith.constant 0 : i32
    %6 = arith.index_cast %c0_i32_6 : i32 to index
    %c0_7 = arith.constant 0 : index
    %c0_8 = arith.constant 0 : index
    %7 = vector.load %arg1[%6, %c0_7, %c0_8] : memref<8x2x384xf32, #tpu.memory_space<vmem>>, vector<1x2x384xf32>
    %8 = vector.shape_cast %7 : vector<1x2x384xf32> to vector<2x384xf32>
    %cst = arith.constant dense<0.000000e+00> : vector<2x384xf32>
    %9 = tpu.matmul %5, %3, %cst {dimension_numbers = #tpu.dot_dimension_numbers<[1], [0], [0], [1], [0, 0, 1, 1], [], []>} : vector<2x64xf32>, vector<64x384xf32>, vector<2x384xf32> -> vector<2x384xf32>
    %10 = vector.extract_strided_slice %8 {offsets = [0, 0], sizes = [2, 64], strides = [1, 1]} : vector<2x384xf32> to vector<2x64xf32>
    %11 = vector.extract_strided_slice %9 {offsets = [0, 0], sizes = [2, 64], strides = [1, 1]} : vector<2x384xf32> to vector<2x64xf32>
    %12 = arith.addf %10, %11 : vector<2x64xf32>
    %13 = arith.negf %12 : vector<2x64xf32>
    %14 = math.exp %13 : vector<2x64xf32>
    %cst_9 = arith.constant 1.000000e+00 : f32
    %15 = vector.broadcast %cst_9 : f32 to vector<2x64xf32>
    %16 = arith.addf %15, %14 : vector<2x64xf32>
    %17 = arith.divf %15, %16 : vector<2x64xf32>
    %18 = vector.extract_strided_slice %8 {offsets = [0, 128], sizes = [2, 64], strides = [1, 1]} : vector<2x384xf32> to vector<2x64xf32>
    %19 = vector.extract_strided_slice %9 {offsets = [0, 128], sizes = [2, 64], strides = [1, 1]} : vector<2x384xf32> to vector<2x64xf32>
    %20 = arith.addf %18, %19 : vector<2x64xf32>
    %21 = arith.negf %20 : vector<2x64xf32>
    %22 = math.exp %21 : vector<2x64xf32>
    %cst_10 = arith.constant 1.000000e+00 : f32
    %23 = vector.broadcast %cst_10 : f32 to vector<2x64xf32>
    %24 = arith.addf %23, %22 : vector<2x64xf32>
    %25 = arith.divf %23, %24 : vector<2x64xf32>
    %26 = vector.extract_strided_slice %8 {offsets = [0, 256], sizes = [2, 64], strides = [1, 1]} : vector<2x384xf32> to vector<2x64xf32>
    %27 = vector.extract_strided_slice %9 {offsets = [0, 256], sizes = [2, 64], strides = [1, 1]} : vector<2x384xf32> to vector<2x64xf32>
    %28 = vector.broadcast %4 : vector<1x64xf32> to vector<2x64xf32>
    %29 = arith.addf %27, %28 : vector<2x64xf32>
    %30 = arith.mulf %17, %29 : vector<2x64xf32>
    %31 = arith.addf %26, %30 : vector<2x64xf32>
    %32 = math.tanh %31 : vector<2x64xf32>
    %cst_11 = arith.constant 1.000000e+00 : f32
    %33 = vector.broadcast %cst_11 : f32 to vector<2x64xf32>
    %34 = arith.subf %33, %25 : vector<2x64xf32>
    %35 = arith.mulf %34, %32 : vector<2x64xf32>
    %36 = arith.mulf %25, %5 : vector<2x64xf32>
    %37 = arith.addf %35, %36 : vector<2x64xf32>
    %38 = arith.index_cast %c0_i32_6 : i32 to index
    %c0_12 = arith.constant 0 : index
    %c0_13 = arith.constant 0 : index
    %39 = vector.load %arg4[%38, %c0_12, %c0_13] : memref<8x2x64xf32, #tpu.memory_space<vmem>>, vector<1x2x64xf32>
    %40 = vector.shape_cast %39 : vector<1x2x64xf32> to vector<2x64xf32>
    %41 = vector.shape_cast %37 : vector<2x64xf32> to vector<1x2x64xf32>
    tpu.vector_store %arg4[%38, %c0_12, %c0_13], %41 {strides = array<i32>} : memref<8x2x64xf32, #tpu.memory_space<vmem>>, vector<1x2x64xf32>,
    %c1_i32 = arith.constant 1 : i32
    %42 = arith.index_cast %c1_i32 : i32 to index
    %c0_14 = arith.constant 0 : index
    %c0_15 = arith.constant 0 : index
    %43 = vector.load %arg1[%42, %c0_14, %c0_15] : memref<8x2x384xf32, #tpu.memory_space<vmem>>, vector<1x2x384xf32>
    %44 = vector.shape_cast %43 : vector<1x2x384xf32> to vector<2x384xf32>
    %cst_16 = arith.constant dense<0.000000e+00> : vector<2x384xf32>
    %45 = tpu.matmul %37, %3, %cst_16 {dimension_numbers = #tpu.dot_dimension_numbers<[1], [0], [0], [1], [0, 0, 1, 1], [], []>} : vector<2x64xf32>, vector<64x384xf32>, vector<2x384xf32> -> vector<2x384xf32>
    %46 = vector.extract_strided_slice %44 {offsets = [0, 0], sizes = [2, 64], strides = [1, 1]} : vector<2x384xf32> to vector<2x64xf32>
    %47 = vector.extract_strided_slice %45 {offsets = [0, 0], sizes = [2, 64], strides = [1, 1]} : vector<2x384xf32> to vector<2x64xf32>
    %48 = arith.addf %46, %47 : vector<2x64xf32>
    %49 = arith.negf %48 : vector<2x64xf32>
    %50 = math.exp %49 : vector<2x64xf32>
    %cst_17 = arith.constant 1.000000e+00 : f32
    %51 = vector.broadcast %cst_17 : f32 to vector<2x64xf32>
    %52 = arith.addf %51, %50 : vector<2x64xf32>
    %53 = arith.divf %51, %52 : vector<2x64xf32>
    %54 = vector.extract_strided_slice %44 {offsets = [0, 128], sizes = [2, 64], strides = [1, 1]} : vector<2x384xf32> to vector<2x64xf32>
    %55 = vector.extract_strided_slice %45 {offsets = [0, 128], sizes = [2, 64], strides = [1, 1]} : vector<2x384xf32> to vector<2x64xf32>
    %56 = arith.addf %54, %55 : vector<2x64xf32>
    %57 = arith.negf %56 : vector<2x64xf32>
    %58 = math.exp %57 : vector<2x64xf32>
    %cst_18 = arith.constant 1.000000e+00 : f32
    %59 = vector.broadcast %cst_18 : f32 to vector<2x64xf32>
    %60 = arith.addf %59, %58 : vector<2x64xf32>
    %61 = arith.divf %59, %60 : vector<2x64xf32>
    %62 = vector.extract_strided_slice %44 {offsets = [0, 256], sizes = [2, 64], strides = [1, 1]} : vector<2x384xf32> to vector<2x64xf32>
    %63 = vector.extract_strided_slice %45 {offsets = [0, 256], sizes = [2, 64], strides = [1, 1]} : vector<2x384xf32> to vector<2x64xf32>
    %64 = vector.broadcast %4 : vector<1x64xf32> to vector<2x64xf32>
    %65 = arith.addf %63, %64 : vector<2x64xf32>
    %66 = arith.mulf %53, %65 : vector<2x64xf32>
    %67 = arith.addf %62, %66 : vector<2x64xf32>
    %68 = math.tanh %67 : vector<2x64xf32>
    %cst_19 = arith.constant 1.000000e+00 : f32
    %69 = vector.broadcast %cst_19 : f32 to vector<2x64xf32>
    %70 = arith.subf %69, %61 : vector<2x64xf32>
    %71 = arith.mulf %70, %68 : vector<2x64xf32>
    %72 = arith.mulf %61, %37 : vector<2x64xf32>
    %73 = arith.addf %71, %72 : vector<2x64xf32>
    %74 = arith.index_cast %c1_i32 : i32 to index
    %c0_20 = arith.constant 0 : index
    %c0_21 = arith.constant 0 : index
    %75 = vector.load %arg4[%74, %c0_20, %c0_21] : memref<8x2x64xf32, #tpu.memory_space<vmem>>, vector<1x2x64xf32>
    %76 = vector.shape_cast %75 : vector<1x2x64xf32> to vector<2x64xf32>
    %77 = vector.shape_cast %73 : vector<2x64xf32> to vector<1x2x64xf32>
    tpu.vector_store %arg4[%74, %c0_20, %c0_21], %77 {strides = array<i32>} : memref<8x2x64xf32, #tpu.memory_space<vmem>>, vector<1x2x64xf32>,
    %c2_i32 = arith.constant 2 : i32
    %78 = arith.index_cast %c2_i32 : i32 to index
    %c0_22 = arith.constant 0 : index
    %c0_23 = arith.constant 0 : index
    %79 = vector.load %arg1[%78, %c0_22, %c0_23] : memref<8x2x384xf32, #tpu.memory_space<vmem>>, vector<1x2x384xf32>
    %80 = vector.shape_cast %79 : vector<1x2x384xf32> to vector<2x384xf32>
    %cst_24 = arith.constant dense<0.000000e+00> : vector<2x384xf32>
    %81 = tpu.matmul %73, %3, %cst_24 {dimension_numbers = #tpu.dot_dimension_numbers<[1], [0], [0], [1], [0, 0, 1, 1], [], []>} : vector<2x64xf32>, vector<64x384xf32>, vector<2x384xf32> -> vector<2x384xf32>
    %82 = vector.extract_strided_slice %80 {offsets = [0, 0], sizes = [2, 64], strides = [1, 1]} : vector<2x384xf32> to vector<2x64xf32>
    %83 = vector.extract_strided_slice %81 {offsets = [0, 0], sizes = [2, 64], strides = [1, 1]} : vector<2x384xf32> to vector<2x64xf32>
    %84 = arith.addf %82, %83 : vector<2x64xf32>
    %85 = arith.negf %84 : vector<2x64xf32>
    %86 = math.exp %85 : vector<2x64xf32>
    %cst_25 = arith.constant 1.000000e+00 : f32
    %87 = vector.broadcast %cst_25 : f32 to vector<2x64xf32>
    %88 = arith.addf %87, %86 : vector<2x64xf32>
    %89 = arith.divf %87, %88 : vector<2x64xf32>
    %90 = vector.extract_strided_slice %80 {offsets = [0, 128], sizes = [2, 64], strides = [1, 1]} : vector<2x384xf32> to vector<2x64xf32>
    %91 = vector.extract_strided_slice %81 {offsets = [0, 128], sizes = [2, 64], strides = [1, 1]} : vector<2x384xf32> to vector<2x64xf32>
    %92 = arith.addf %90, %91 : vector<2x64xf32>
    %93 = arith.negf %92 : vector<2x64xf32>
    %94 = math.exp %93 : vector<2x64xf32>
    %cst_26 = arith.constant 1.000000e+00 : f32
    %95 = vector.broadcast %cst_26 : f32 to vector<2x64xf32>
    %96 = arith.addf %95, %94 : vector<2x64xf32>
    %97 = arith.divf %95, %96 : vector<2x64xf32>
    %98 = vector.extract_strided_slice %80 {offsets = [0, 256], sizes = [2, 64], strides = [1, 1]} : vector<2x384xf32> to vector<2x64xf32>
    %99 = vector.extract_strided_slice %81 {offsets = [0, 256], sizes = [2, 64], strides = [1, 1]} : vector<2x384xf32> to vector<2x64xf32>
    %100 = vector.broadcast %4 : vector<1x64xf32> to vector<2x64xf32>
    %101 = arith.addf %99, %100 : vector<2x64xf32>
    %102 = arith.mulf %89, %101 : vector<2x64xf32>
    %103 = arith.addf %98, %102 : vector<2x64xf32>
    %104 = math.tanh %103 : vector<2x64xf32>
    %cst_27 = arith.constant 1.000000e+00 : f32
    %105 = vector.broadcast %cst_27 : f32 to vector<2x64xf32>
    %106 = arith.subf %105, %97 : vector<2x64xf32>
    %107 = arith.mulf %106, %104 : vector<2x64xf32>
    %108 = arith.mulf %97, %73 : vector<2x64xf32>
    %109 = arith.addf %107, %108 : vector<2x64xf32>
    %110 = arith.index_cast %c2_i32 : i32 to index
    %c0_28 = arith.constant 0 : index
    %c0_29 = arith.constant 0 : index
    %111 = vector.load %arg4[%110, %c0_28, %c0_29] : memref<8x2x64xf32, #tpu.memory_space<vmem>>, vector<1x2x64xf32>
    %112 = vector.shape_cast %111 : vector<1x2x64xf32> to vector<2x64xf32>
    %113 = vector.shape_cast %109 : vector<2x64xf32> to vector<1x2x64xf32>
    tpu.vector_store %arg4[%110, %c0_28, %c0_29], %113 {strides = array<i32>} : memref<8x2x64xf32, #tpu.memory_space<vmem>>, vector<1x2x64xf32>,
    %c3_i32 = arith.constant 3 : i32
    %114 = arith.index_cast %c3_i32 : i32 to index
    %c0_30 = arith.constant 0 : index
    %c0_31 = arith.constant 0 : index
    %115 = vector.load %arg1[%114, %c0_30, %c0_31] : memref<8x2x384xf32, #tpu.memory_space<vmem>>, vector<1x2x384xf32>
    %116 = vector.shape_cast %115 : vector<1x2x384xf32> to vector<2x384xf32>
    %cst_32 = arith.constant dense<0.000000e+00> : vector<2x384xf32>
    %117 = tpu.matmul %109, %3, %cst_32 {dimension_numbers = #tpu.dot_dimension_numbers<[1], [0], [0], [1], [0, 0, 1, 1], [], []>} : vector<2x64xf32>, vector<64x384xf32>, vector<2x384xf32> -> vector<2x384xf32>
    %118 = vector.extract_strided_slice %116 {offsets = [0, 0], sizes = [2, 64], strides = [1, 1]} : vector<2x384xf32> to vector<2x64xf32>
    %119 = vector.extract_strided_slice %117 {offsets = [0, 0], sizes = [2, 64], strides = [1, 1]} : vector<2x384xf32> to vector<2x64xf32>
    %120 = arith.addf %118, %119 : vector<2x64xf32>
    %121 = arith.negf %120 : vector<2x64xf32>
    %122 = math.exp %121 : vector<2x64xf32>
    %cst_33 = arith.constant 1.000000e+00 : f32
    %123 = vector.broadcast %cst_33 : f32 to vector<2x64xf32>
    %124 = arith.addf %123, %122 : vector<2x64xf32>
    %125 = arith.divf %123, %124 : vector<2x64xf32>
    %126 = vector.extract_strided_slice %116 {offsets = [0, 128], sizes = [2, 64], strides = [1, 1]} : vector<2x384xf32> to vector<2x64xf32>
    %127 = vector.extract_strided_slice %117 {offsets = [0, 128], sizes = [2, 64], strides = [1, 1]} : vector<2x384xf32> to vector<2x64xf32>
    %128 = arith.addf %126, %127 : vector<2x64xf32>
    %129 = arith.negf %128 : vector<2x64xf32>
    %130 = math.exp %129 : vector<2x64xf32>
    %cst_34 = arith.constant 1.000000e+00 : f32
    %131 = vector.broadcast %cst_34 : f32 to vector<2x64xf32>
    %132 = arith.addf %131, %130 : vector<2x64xf32>
    %133 = arith.divf %131, %132 : vector<2x64xf32>
    %134 = vector.extract_strided_slice %116 {offsets = [0, 256], sizes = [2, 64], strides = [1, 1]} : vector<2x384xf32> to vector<2x64xf32>
    %135 = vector.extract_strided_slice %117 {offsets = [0, 256], sizes = [2, 64], strides = [1, 1]} : vector<2x384xf32> to vector<2x64xf32>
    %136 = vector.broadcast %4 : vector<1x64xf32> to vector<2x64xf32>
    %137 = arith.addf %135, %136 : vector<2x64xf32>
    %138 = arith.mulf %125, %137 : vector<2x64xf32>
    %139 = arith.addf %134, %138 : vector<2x64xf32>
    %140 = math.tanh %139 : vector<2x64xf32>
    %cst_35 = arith.constant 1.000000e+00 : f32
    %141 = vector.broadcast %cst_35 : f32 to vector<2x64xf32>
    %142 = arith.subf %141, %133 : vector<2x64xf32>
    %143 = arith.mulf %142, %140 : vector<2x64xf32>
    %144 = arith.mulf %133, %109 : vector<2x64xf32>
    %145 = arith.addf %143, %144 : vector<2x64xf32>
    %146 = arith.index_cast %c3_i32 : i32 to index
    %c0_36 = arith.constant 0 : index
    %c0_37 = arith.constant 0 : index
    %147 = vector.load %arg4[%146, %c0_36, %c0_37] : memref<8x2x64xf32, #tpu.memory_space<vmem>>, vector<1x2x64xf32>
    %148 = vector.shape_cast %147 : vector<1x2x64xf32> to vector<2x64xf32>
    %149 = vector.shape_cast %145 : vector<2x64xf32> to vector<1x2x64xf32>
    tpu.vector_store %arg4[%146, %c0_36, %c0_37], %149 {strides = array<i32>} : memref<8x2x64xf32, #tpu.memory_space<vmem>>, vector<1x2x64xf32>,
    %c4_i32 = arith.constant 4 : i32
    %150 = arith.index_cast %c4_i32 : i32 to index
    %c0_38 = arith.constant 0 : index
    %c0_39 = arith.constant 0 : index
    %151 = vector.load %arg1[%150, %c0_38, %c0_39] : memref<8x2x384xf32, #tpu.memory_space<vmem>>, vector<1x2x384xf32>
    %152 = vector.shape_cast %151 : vector<1x2x384xf32> to vector<2x384xf32>
    %cst_40 = arith.constant dense<0.000000e+00> : vector<2x384xf32>
    %153 = tpu.matmul %145, %3, %cst_40 {dimension_numbers = #tpu.dot_dimension_numbers<[1], [0], [0], [1], [0, 0, 1, 1], [], []>} : vector<2x64xf32>, vector<64x384xf32>, vector<2x384xf32> -> vector<2x384xf32>
    %154 = vector.extract_strided_slice %152 {offsets = [0, 0], sizes = [2, 64], strides = [1, 1]} : vector<2x384xf32> to vector<2x64xf32>
    %155 = vector.extract_strided_slice %153 {offsets = [0, 0], sizes = [2, 64], strides = [1, 1]} : vector<2x384xf32> to vector<2x64xf32>
    %156 = arith.addf %154, %155 : vector<2x64xf32>
    %157 = arith.negf %156 : vector<2x64xf32>
    %158 = math.exp %157 : vector<2x64xf32>
    %cst_41 = arith.constant 1.000000e+00 : f32
    %159 = vector.broadcast %cst_41 : f32 to vector<2x64xf32>
    %160 = arith.addf %159, %158 : vector<2x64xf32>
    %161 = arith.divf %159, %160 : vector<2x64xf32>
    %162 = vector.extract_strided_slice %152 {offsets = [0, 128], sizes = [2, 64], strides = [1, 1]} : vector<2x384xf32> to vector<2x64xf32>
    %163 = vector.extract_strided_slice %153 {offsets = [0, 128], sizes = [2, 64], strides = [1, 1]} : vector<2x384xf32> to vector<2x64xf32>
    %164 = arith.addf %162, %163 : vector<2x64xf32>
    %165 = arith.negf %164 : vector<2x64xf32>
    %166 = math.exp %165 : vector<2x64xf32>
    %cst_42 = arith.constant 1.000000e+00 : f32
    %167 = vector.broadcast %cst_42 : f32 to vector<2x64xf32>
    %168 = arith.addf %167, %166 : vector<2x64xf32>
    %169 = arith.divf %167, %168 : vector<2x64xf32>
    %170 = vector.extract_strided_slice %152 {offsets = [0, 256], sizes = [2, 64], strides = [1, 1]} : vector<2x384xf32> to vector<2x64xf32>
    %171 = vector.extract_strided_slice %153 {offsets = [0, 256], sizes = [2, 64], strides = [1, 1]} : vector<2x384xf32> to vector<2x64xf32>
    %172 = vector.broadcast %4 : vector<1x64xf32> to vector<2x64xf32>
    %173 = arith.addf %171, %172 : vector<2x64xf32>
    %174 = arith.mulf %161, %173 : vector<2x64xf32>
    %175 = arith.addf %170, %174 : vector<2x64xf32>
    %176 = math.tanh %175 : vector<2x64xf32>
    %cst_43 = arith.constant 1.000000e+00 : f32
    %177 = vector.broadcast %cst_43 : f32 to vector<2x64xf32>
    %178 = arith.subf %177, %169 : vector<2x64xf32>
    %179 = arith.mulf %178, %176 : vector<2x64xf32>
    %180 = arith.mulf %169, %145 : vector<2x64xf32>
    %181 = arith.addf %179, %180 : vector<2x64xf32>
    %182 = arith.index_cast %c4_i32 : i32 to index
    %c0_44 = arith.constant 0 : index
    %c0_45 = arith.constant 0 : index
    %183 = vector.load %arg4[%182, %c0_44, %c0_45] : memref<8x2x64xf32, #tpu.memory_space<vmem>>, vector<1x2x64xf32>
    %184 = vector.shape_cast %183 : vector<1x2x64xf32> to vector<2x64xf32>
    %185 = vector.shape_cast %181 : vector<2x64xf32> to vector<1x2x64xf32>
    tpu.vector_store %arg4[%182, %c0_44, %c0_45], %185 {strides = array<i32>} : memref<8x2x64xf32, #tpu.memory_space<vmem>>, vector<1x2x64xf32>,
    %c5_i32 = arith.constant 5 : i32
    %186 = arith.index_cast %c5_i32 : i32 to index
    %c0_46 = arith.constant 0 : index
    %c0_47 = arith.constant 0 : index
    %187 = vector.load %arg1[%186, %c0_46, %c0_47] : memref<8x2x384xf32, #tpu.memory_space<vmem>>, vector<1x2x384xf32>
    %188 = vector.shape_cast %187 : vector<1x2x384xf32> to vector<2x384xf32>
    %cst_48 = arith.constant dense<0.000000e+00> : vector<2x384xf32>
    %189 = tpu.matmul %181, %3, %cst_48 {dimension_numbers = #tpu.dot_dimension_numbers<[1], [0], [0], [1], [0, 0, 1, 1], [], []>} : vector<2x64xf32>, vector<64x384xf32>, vector<2x384xf32> -> vector<2x384xf32>
    %190 = vector.extract_strided_slice %188 {offsets = [0, 0], sizes = [2, 64], strides = [1, 1]} : vector<2x384xf32> to vector<2x64xf32>
    %191 = vector.extract_strided_slice %189 {offsets = [0, 0], sizes = [2, 64], strides = [1, 1]} : vector<2x384xf32> to vector<2x64xf32>
    %192 = arith.addf %190, %191 : vector<2x64xf32>
    %193 = arith.negf %192 : vector<2x64xf32>
    %194 = math.exp %193 : vector<2x64xf32>
    %cst_49 = arith.constant 1.000000e+00 : f32
    %195 = vector.broadcast %cst_49 : f32 to vector<2x64xf32>
    %196 = arith.addf %195, %194 : vector<2x64xf32>
    %197 = arith.divf %195, %196 : vector<2x64xf32>
    %198 = vector.extract_strided_slice %188 {offsets = [0, 128], sizes = [2, 64], strides = [1, 1]} : vector<2x384xf32> to vector<2x64xf32>
    %199 = vector.extract_strided_slice %189 {offsets = [0, 128], sizes = [2, 64], strides = [1, 1]} : vector<2x384xf32> to vector<2x64xf32>
    %200 = arith.addf %198, %199 : vector<2x64xf32>
    %201 = arith.negf %200 : vector<2x64xf32>
    %202 = math.exp %201 : vector<2x64xf32>
    %cst_50 = arith.constant 1.000000e+00 : f32
    %203 = vector.broadcast %cst_50 : f32 to vector<2x64xf32>
    %204 = arith.addf %203, %202 : vector<2x64xf32>
    %205 = arith.divf %203, %204 : vector<2x64xf32>
    %206 = vector.extract_strided_slice %188 {offsets = [0, 256], sizes = [2, 64], strides = [1, 1]} : vector<2x384xf32> to vector<2x64xf32>
    %207 = vector.extract_strided_slice %189 {offsets = [0, 256], sizes = [2, 64], strides = [1, 1]} : vector<2x384xf32> to vector<2x64xf32>
    %208 = vector.broadcast %4 : vector<1x64xf32> to vector<2x64xf32>
    %209 = arith.addf %207, %208 : vector<2x64xf32>
    %210 = arith.mulf %197, %209 : vector<2x64xf32>
    %211 = arith.addf %206, %210 : vector<2x64xf32>
    %212 = math.tanh %211 : vector<2x64xf32>
    %cst_51 = arith.constant 1.000000e+00 : f32
    %213 = vector.broadcast %cst_51 : f32 to vector<2x64xf32>
    %214 = arith.subf %213, %205 : vector<2x64xf32>
    %215 = arith.mulf %214, %212 : vector<2x64xf32>
    %216 = arith.mulf %205, %181 : vector<2x64xf32>
    %217 = arith.addf %215, %216 : vector<2x64xf32>
    %218 = arith.index_cast %c5_i32 : i32 to index
    %c0_52 = arith.constant 0 : index
    %c0_53 = arith.constant 0 : index
    %219 = vector.load %arg4[%218, %c0_52, %c0_53] : memref<8x2x64xf32, #tpu.memory_space<vmem>>, vector<1x2x64xf32>
    %220 = vector.shape_cast %219 : vector<1x2x64xf32> to vector<2x64xf32>
    %221 = vector.shape_cast %217 : vector<2x64xf32> to vector<1x2x64xf32>
    tpu.vector_store %arg4[%218, %c0_52, %c0_53], %221 {strides = array<i32>} : memref<8x2x64xf32, #tpu.memory_space<vmem>>, vector<1x2x64xf32>,
    %c6_i32 = arith.constant 6 : i32
    %222 = arith.index_cast %c6_i32 : i32 to index
    %c0_54 = arith.constant 0 : index
    %c0_55 = arith.constant 0 : index
    %223 = vector.load %arg1[%222, %c0_54, %c0_55] : memref<8x2x384xf32, #tpu.memory_space<vmem>>, vector<1x2x384xf32>
    %224 = vector.shape_cast %223 : vector<1x2x384xf32> to vector<2x384xf32>
    %cst_56 = arith.constant dense<0.000000e+00> : vector<2x384xf32>
    %225 = tpu.matmul %217, %3, %cst_56 {dimension_numbers = #tpu.dot_dimension_numbers<[1], [0], [0], [1], [0, 0, 1, 1], [], []>} : vector<2x64xf32>, vector<64x384xf32>, vector<2x384xf32> -> vector<2x384xf32>
    %226 = vector.extract_strided_slice %224 {offsets = [0, 0], sizes = [2, 64], strides = [1, 1]} : vector<2x384xf32> to vector<2x64xf32>
    %227 = vector.extract_strided_slice %225 {offsets = [0, 0], sizes = [2, 64], strides = [1, 1]} : vector<2x384xf32> to vector<2x64xf32>
    %228 = arith.addf %226, %227 : vector<2x64xf32>
    %229 = arith.negf %228 : vector<2x64xf32>
    %230 = math.exp %229 : vector<2x64xf32>
    %cst_57 = arith.constant 1.000000e+00 : f32
    %231 = vector.broadcast %cst_57 : f32 to vector<2x64xf32>
    %232 = arith.addf %231, %230 : vector<2x64xf32>
    %233 = arith.divf %231, %232 : vector<2x64xf32>
    %234 = vector.extract_strided_slice %224 {offsets = [0, 128], sizes = [2, 64], strides = [1, 1]} : vector<2x384xf32> to vector<2x64xf32>
    %235 = vector.extract_strided_slice %225 {offsets = [0, 128], sizes = [2, 64], strides = [1, 1]} : vector<2x384xf32> to vector<2x64xf32>
    %236 = arith.addf %234, %235 : vector<2x64xf32>
    %237 = arith.negf %236 : vector<2x64xf32>
    %238 = math.exp %237 : vector<2x64xf32>
    %cst_58 = arith.constant 1.000000e+00 : f32
    %239 = vector.broadcast %cst_58 : f32 to vector<2x64xf32>
    %240 = arith.addf %239, %238 : vector<2x64xf32>
    %241 = arith.divf %239, %240 : vector<2x64xf32>
    %242 = vector.extract_strided_slice %224 {offsets = [0, 256], sizes = [2, 64], strides = [1, 1]} : vector<2x384xf32> to vector<2x64xf32>
    %243 = vector.extract_strided_slice %225 {offsets = [0, 256], sizes = [2, 64], strides = [1, 1]} : vector<2x384xf32> to vector<2x64xf32>
    %244 = vector.broadcast %4 : vector<1x64xf32> to vector<2x64xf32>
    %245 = arith.addf %243, %244 : vector<2x64xf32>
    %246 = arith.mulf %233, %245 : vector<2x64xf32>
    %247 = arith.addf %242, %246 : vector<2x64xf32>
    %248 = math.tanh %247 : vector<2x64xf32>
    %cst_59 = arith.constant 1.000000e+00 : f32
    %249 = vector.broadcast %cst_59 : f32 to vector<2x64xf32>
    %250 = arith.subf %249, %241 : vector<2x64xf32>
    %251 = arith.mulf %250, %248 : vector<2x64xf32>
    %252 = arith.mulf %241, %217 : vector<2x64xf32>
    %253 = arith.addf %251, %252 : vector<2x64xf32>
    %254 = arith.index_cast %c6_i32 : i32 to index
    %c0_60 = arith.constant 0 : index
    %c0_61 = arith.constant 0 : index
    %255 = vector.load %arg4[%254, %c0_60, %c0_61] : memref<8x2x64xf32, #tpu.memory_space<vmem>>, vector<1x2x64xf32>
    %256 = vector.shape_cast %255 : vector<1x2x64xf32> to vector<2x64xf32>
    %257 = vector.shape_cast %253 : vector<2x64xf32> to vector<1x2x64xf32>
    tpu.vector_store %arg4[%254, %c0_60, %c0_61], %257 {strides = array<i32>} : memref<8x2x64xf32, #tpu.memory_space<vmem>>, vector<1x2x64xf32>,
    %c7_i32 = arith.constant 7 : i32
    %258 = arith.index_cast %c7_i32 : i32 to index
    %c0_62 = arith.constant 0 : index
    %c0_63 = arith.constant 0 : index
    %259 = vector.load %arg1[%258, %c0_62, %c0_63] : memref<8x2x384xf32, #tpu.memory_space<vmem>>, vector<1x2x384xf32>
    %260 = vector.shape_cast %259 : vector<1x2x384xf32> to vector<2x384xf32>
    %cst_64 = arith.constant dense<0.000000e+00> : vector<2x384xf32>
    %261 = tpu.matmul %253, %3, %cst_64 {dimension_numbers = #tpu.dot_dimension_numbers<[1], [0], [0], [1], [0, 0, 1, 1], [], []>} : vector<2x64xf32>, vector<64x384xf32>, vector<2x384xf32> -> vector<2x384xf32>
    %262 = vector.extract_strided_slice %260 {offsets = [0, 0], sizes = [2, 64], strides = [1, 1]} : vector<2x384xf32> to vector<2x64xf32>
    %263 = vector.extract_strided_slice %261 {offsets = [0, 0], sizes = [2, 64], strides = [1, 1]} : vector<2x384xf32> to vector<2x64xf32>
    %264 = arith.addf %262, %263 : vector<2x64xf32>
    %265 = arith.negf %264 : vector<2x64xf32>
    %266 = math.exp %265 : vector<2x64xf32>
    %cst_65 = arith.constant 1.000000e+00 : f32
    %267 = vector.broadcast %cst_65 : f32 to vector<2x64xf32>
    %268 = arith.addf %267, %266 : vector<2x64xf32>
    %269 = arith.divf %267, %268 : vector<2x64xf32>
    %270 = vector.extract_strided_slice %260 {offsets = [0, 128], sizes = [2, 64], strides = [1, 1]} : vector<2x384xf32> to vector<2x64xf32>
    %271 = vector.extract_strided_slice %261 {offsets = [0, 128], sizes = [2, 64], strides = [1, 1]} : vector<2x384xf32> to vector<2x64xf32>
    %272 = arith.addf %270, %271 : vector<2x64xf32>
    %273 = arith.negf %272 : vector<2x64xf32>
    %274 = math.exp %273 : vector<2x64xf32>
    %cst_66 = arith.constant 1.000000e+00 : f32
    %275 = vector.broadcast %cst_66 : f32 to vector<2x64xf32>
    %276 = arith.addf %275, %274 : vector<2x64xf32>
    %277 = arith.divf %275, %276 : vector<2x64xf32>
    %278 = vector.extract_strided_slice %260 {offsets = [0, 256], sizes = [2, 64], strides = [1, 1]} : vector<2x384xf32> to vector<2x64xf32>
    %279 = vector.extract_strided_slice %261 {offsets = [0, 256], sizes = [2, 64], strides = [1, 1]} : vector<2x384xf32> to vector<2x64xf32>
    %280 = vector.broadcast %4 : vector<1x64xf32> to vector<2x64xf32>
    %281 = arith.addf %279, %280 : vector<2x64xf32>
    %282 = arith.mulf %269, %281 : vector<2x64xf32>
    %283 = arith.addf %278, %282 : vector<2x64xf32>
    %284 = math.tanh %283 : vector<2x64xf32>
    %cst_67 = arith.constant 1.000000e+00 : f32
    %285 = vector.broadcast %cst_67 : f32 to vector<2x64xf32>
    %286 = arith.subf %285, %277 : vector<2x64xf32>
    %287 = arith.mulf %286, %284 : vector<2x64xf32>
    %288 = arith.mulf %277, %253 : vector<2x64xf32>
    %289 = arith.addf %287, %288 : vector<2x64xf32>
    %290 = arith.index_cast %c7_i32 : i32 to index
    %c0_68 = arith.constant 0 : index
    %c0_69 = arith.constant 0 : index
    %291 = vector.load %arg4[%290, %c0_68, %c0_69] : memref<8x2x64xf32, #tpu.memory_space<vmem>>, vector<1x2x64xf32>
    %292 = vector.shape_cast %291 : vector<1x2x64xf32> to vector<2x64xf32>
    %293 = vector.shape_cast %289 : vector<2x64xf32> to vector<1x2x64xf32>
    tpu.vector_store %arg4[%290, %c0_68, %c0_69], %293 {strides = array<i32>} : memref<8x2x64xf32, #tpu.memory_space<vmem>>, vector<1x2x64xf32>,
    %c8_i32 = arith.constant 8 : i32
    %c0_70 = arith.constant 0 : index
    %c0_71 = arith.constant 0 : index
    %294 = vector.load %arg5[%c0_70, %c0_71] : memref<2x64xf32, #tpu.memory_space<vmem>>, vector<2x64xf32>
    tpu.vector_store %arg5[%c0_70, %c0_71], %289 {strides = array<i32>} : memref<2x64xf32, #tpu.memory_space<vmem>>, vector<2x64xf32>,
    return
  }
  func.func @transform_0(%arg0: i32) -> (i32, i32, i32) {
    %c0_i32 = arith.constant 0 : i32
    %c0_i32_0 = arith.constant 0 : i32
    %c0_i32_1 = arith.constant 0 : i32
    return %arg0, %c0_i32, %c0_i32_0 : i32, i32, i32
  }
  func.func @transform_1(%arg0: i32) -> (i32, i32) {
    %c0_i32 = arith.constant 0 : i32
    %c0_i32_0 = arith.constant 0 : i32
    %c0_i32_1 = arith.constant 0 : i32
    return %c0_i32, %c0_i32_0 : i32, i32
  }
  func.func @transform_2(%arg0: i32) -> (i32, i32) {
    %c0_i32 = arith.constant 0 : i32
    %c0_i32_0 = arith.constant 0 : i32
    %c0_i32_1 = arith.constant 0 : i32
    return %c0_i32, %c0_i32_0 : i32, i32
  }
  func.func @transform_3(%arg0: i32) -> (i32, i32, i32) {
    %c0_i32 = arith.constant 0 : i32
    %c0_i32_0 = arith.constant 0 : i32
    %c0_i32_1 = arith.constant 0 : i32
    return %arg0, %c0_i32, %c0_i32_0 : i32, i32, i32
  }
}

</mosaic_0001>

<bundles_post_ra>
// kernel: context_network_forward.1
= control target key start
LH: loop header
LB: loop body
LE: loop exit
PB: predicated region body
PF: predicated region fallthrough
CT: control target
= control target key end

     0   :  { %vm18_vm0 = vcmask 517120   ;;  %v2035_v3 = vmov 0.0   ;;  %v2036_v4 = vmov 0.0|0.0   ;;  %vm2037_vm1 = vmmov 0   ;;  %s2394_s1 = inlined_call_operand.vmem [shape: f32[64,384], index: 1, kind: input, shape index: {}]   ;;  %s2395_s0 = inlined_call_operand.vmem [shape: f32[8,2,384], index: 0, kind: input, shape index: {}]   ;;  %s2396_s2 = inlined_call_operand.vmem [shape: f32[1,64], index: 2, kind: input, shape index: {}]   ;;  %s2397_s3 = inlined_call_operand.vmem [shape: f32[8,2,64], index: 3, kind: output, shape index: {}]  }
   0x1   :  { %v21_v0 = vld [vmem:[%s2394_s1 + $0x8] sm:$0xff]  ;;  %v24_v1 = vld [vmem:[%s2394_s1 + $0x20] sm:$0xff]  ;;  %115 = vmatprep.mubr.f32.mxu0 %v2035_v3  ;;  %19 = vst.msk [vmem:[#allocation2] sm:$0x3] %vm18_vm0, %v2035_v3  ;;  %1744 = vmatprep.subr.bf16.mxu1 %v2036_v4  ;;  %v23_v6 = vld [vmem:[%s2394_s1 + $0x18] sm:$0xff]  ;;  %vm47_vm2 = vcmask 523264  }
   0x2   :  { %v20_v2 = vld [vmem:[%s2394_s1] sm:$0xff]  ;;  %v2071_v5 = vpack.c.bf16 %v24_v1, %v21_v0  ;;  %v27_v7 = vld [vmem:[%s2394_s1 + $0x38] sm:$0xff]  ;;  %v30_v8 = vld [vmem:[%s2394_s1 + $0x50] sm:$0xff]  ;;  %1592 = vmatprep.mubr.msk.f32.mxu1 %vm2037_vm1, %v2035_v3 }
   0x3   :  { %v2084_v9 = vpack.c.bf16 %v23_v6, %v20_v2  ;;  %v2086_v10 = vpack.c.bf16 %v30_v8, %v27_v7  ;;  %v26_v11 = vld [vmem:[%s2394_s1 + $0x30] sm:$0xff]  ;;  %v29_v12 = vld [vmem:[%s2394_s1 + $0x48] sm:$0xff]  ;;  %v36_v14 = vld [vmem:[%s2394_s1 + $0x80] sm:$0xff] }
   0x4   :  { %v33_v13 = vld [vmem:[%s2394_s1 + $0x68] sm:$0xff]  ;;  %1729 = vmatprep.subr.bf16.mxu0 %v2071_v5  ;;  %v2102_v15 = vpack.c.bf16 %v29_v12, %v26_v11  ;;  %v32_v16 = vld [vmem:[%s2394_s1 + $0x60] sm:$0xff]  ;;  %v35_v17 = vld [vmem:[%s2394_s1 + $0x78] sm:$0xff] }
   0x5   :  { %1731 = vmatpush1.bf16.msra.mxu0 %v2084_v9  ;;  %v2111_v18 = vpack.c.bf16 %v36_v14, %v33_v13  ;;  %v39_v19 = vld [vmem:[%s2394_s1 + $0x98] sm:$0xff]  ;;  %v22_v20 = vld [vmem:[%s2394_s1 + $0x10] sm:$0xff]  ;;  %v25_v21 = vld [vmem:[%s2394_s1 + $0x28] sm:$0xff]  ;;  %v2134_v26 = vpack.c.bf16 %v35_v17, %v32_v16 }
   0x6   :  { %1733 = vmatprep.subr.bf16.mxu0 %v2086_v10  ;;  %v42_v22 = vld [vmem:[%s2394_s1 + $0xb0] sm:$0xff]  ;;  %v2125_v23 = vpack.c.bf16 %v25_v21, %v22_v20  ;;  %v28_v24 = vld [vmem:[%s2394_s1 + $0x40] sm:$0xff]  ;;  %v31_v25 = vld [vmem:[%s2394_s1 + $0x58] sm:$0xff] }
   0x7   :  { %v38_v27 = vld [vmem:[%s2394_s1 + $0x90] sm:$0xff]  ;;  %v2140_v28 = vpack.c.bf16 %v31_v25, %v28_v24  ;;  %v2143_v29 = vpack.c.bf16 %v42_v22, %v39_v19  ;;  %v41_v30 = vld [vmem:[%s2394_s1 + $0xa8] sm:$0xff]  ;;  %v40_v35 = vld [vmem:[%s2394_s1 + $0xa0] sm:$0xff] }
   0x8   :  { %1746 = vmatpush3.bf16.msra.mxu1 %v2125_v23  ;;  %v34_v31 = vld [vmem:[%s2394_s1 + $0x70] sm:$0xff]  ;;  %v37_v32 = vld [vmem:[%s2394_s1 + $0x88] sm:$0xff]  ;;  %v2156_v33 = vpack.c.bf16 %v41_v30, %v38_v27  ;;  %v43_v36 = vld [vmem:[%s2394_s1 + $0xb8] sm:$0xff] }
   0x9   :  { %1735 = vmatpush1.bf16.msra.mxu0 %v2102_v15  ;;  %1747 = vmatprep.subr.bf16.mxu1 %v2036_v4  ;;  %v2159_v34 = vpack.c.bf16 %v37_v32, %v34_v31  ;;  %v45_v37 = vld [vmem:[#allocation2] sm:$0x3]  ;;  %v2171_v38 = vpack.c.bf16 %v43_v36, %v40_v35  ;;  %v1462_v1 = vld [vmem:[%s2395_s0 + $0x6] sm:$0x3f] }
   0xa   :  { %1737 = vmatprep.subr.bf16.mxu0 %v2111_v18  ;;  %v46_v39 = vld [vmem:[%s2395_s0] sm:$0x3f]  ;;  %v381_v7 = vrot.slane %v1462_v1, 2  ;;  %v392_v22 = vrot.slane %v1462_v1, 4 }
   0xb   :  { %v200_v41 = vrot.slane %v46_v39, 2  ;;  %v2204_v52 = vld [vmem:[%s2396_s2] ss:$0 sm:$0xff]  ;;  %v217_v55 = vrot.slane %v46_v39, 4 }
   0xc   :  { %1749 = vmatpush3.bf16.msra.mxu1 %v2140_v28 }
   0xd   :  { %1739 = vmatpush1.bf16.msra.mxu0 %v2134_v26  ;;  %1750 = vmatprep.subr.bf16.mxu1 %v2036_v4 }
   0xe   :  { %1741 = vmatprep.subr.bf16.mxu0 %v2143_v29 }
  0x10   :  { %1752 = vmatpush3.bf16.msra.mxu1 %v2159_v34 }
  0x11   :  { %1743 = vmatpush1.bf16.msra.mxu0 %v2156_v33  ;;  %1753 = vmatprep.subr.bf16.mxu1 %v2036_v4 }
  0x12   :  { %1757 = vmatprep.subr.bf16.mxu0 %v2071_v5 }
  0x14   :  { %1457 = vmatmul.mubr.msk.f32.vlgmr.msra.gmra.mrb[0].mxu0 %vm47_vm2, %v45_v37  ;;  %1755 = vmatpush3.bf16.msra.mxu1 %v2171_v38 }
  0x15   :  { %1759 = vmatpush1.bf16.msra.mxu0 %v2084_v9  ;;  %1772 = vmatprep.subr.bf16.mxu1 %v2036_v4 }
  0x16   :  { %1761 = vmatprep.subr.bf16.mxu0 %v2086_v10  ;;  %296 = vmatprep.mubr.f32.mxu0 %v2035_v3 }
  0x17   :  { %1593 = vmatmul.mubr.msk.f32.vlgmr.msra.gmra.mrb[0].mxu1 %vm47_vm2, %v45_v37 }
  0x18   :  { %1774 = vmatpush3.bf16.msra.mxu1 %v2125_v23  ;;  %1611 = vmatprep.mubr.msk.f32.mxu1 %vm2037_vm1, %v2035_v3 }
  0x19   :  { %1763 = vmatpush1.bf16.msra.mxu0 %v2102_v15  ;;  %1775 = vmatprep.subr.bf16.mxu1 %v2036_v4 }
  0x1a   :  { %1765 = vmatprep.subr.bf16.mxu0 %v2111_v18 }
  0x1c   :  { %1777 = vmatpush3.bf16.msra.mxu1 %v2140_v28 }
  0x1d   :  { %1767 = vmatpush1.bf16.msra.mxu0 %v2134_v26  ;;  %1778 = vmatprep.subr.bf16.mxu1 %v2036_v4 }
  0x1e   :  { %1769 = vmatprep.subr.bf16.mxu0 %v2143_v29 }
  0x20   :  { %1780 = vmatpush3.bf16.msra.mxu1 %v2159_v34 }
  0x21   :  { %1771 = vmatpush1.bf16.msra.mxu0 %v2156_v33  ;;  %1781 = vmatprep.subr.bf16.mxu1 %v2036_v4 }
  0x22   :  { %1785 = vmatprep.subr.bf16.mxu0 %v2071_v5 }
  0x24   :  { %1783 = vmatpush3.bf16.msra.mxu1 %v2171_v38 }
  0x25   :  { %1800 = vmatprep.subr.bf16.mxu1 %v2036_v4 }
  0xe7   :  { %v117_v40 = vpop.f32.mrb[0].mxu0 }
  0xe8   :  { %v192_v42 = vadd.f32 %v117_v40, %v46_v39  ;;  %v119_v43 = vpop.f32.mrb[1].mxu0  ;;  %v1468_v40 = vld [vmem:[%s2395_s0 + $0xc] sm:$0x3f] }
  0xe9   :  { %v202_v45 = vadd.f32 %v200_v41, %v119_v43  ;;  %v556_v43 = vrot.slane %v1468_v40, 2 }
  0xea   :  { %v1459_v44 = vmul.f32 -1.442695, %v192_v42  ;;  %v188_v46 = vpop.f32.mrb[0].mxu1 }
  0xeb   :  { %v1594_v47 = vpop.f32.mrb[1].mxu1  ;;  %v1460_v48 = vmul.f32 -1.442695, %v202_v45  ;;  %v215_v54 = vadd.f32 %v2204_v52, %v188_v46 }
  0xec   :  { %1955 = vpow2.f32 %v1459_v44 }
  0xed   :  { %1957 = vpow2.f32 %v1460_v48 }
  0xf6   :  { %v1956_v49 = vpop.eup %1955 }
  0xf7   :  { %v196_v50 = vadd.f32 1.0, %v1956_v49  ;;  %v1958_v51 = vpop.eup %1957 }
  0xf8   :  { %v206_v53 = vadd.f32 1.0, %v1958_v51 }
  0xf9   :  { %1959 = vrcp.f32 %v196_v50 }
  0xfa   :  { %1961 = vrcp.f32 %v206_v53 }
 0x103   :  { %v1960_v56 = vpop.eup %1959 }
 0x104   :  { %v216_v57 = vmul.f32 %v1960_v56, %v215_v54  ;;  %v1962_v59 = vpop.eup %1961 }
 0x105   :  { %v221_v60 = vsub.f32 1.0, %v1962_v59  ;;  %v223_v63 = vmul.f32 %v1962_v59, %v45_v37 }
 0x106   :  { %v219_v58 = vadd.f32 %v217_v55, %v216_v57  ;;  %v567_v55 = vrot.slane %v1468_v40, 4 }
 0x108   :  { %1963 = vtanh.f32 %v219_v58 }
 0x112   :  { %v1964_v61 = vpop.eup %1963 }
 0x113   :  { %v222_v62 = vmul.f32 %v1964_v61, %v221_v60 }
 0x115   :  { %v224_v0 = vadd.f32 %v223_v63, %v222_v62 }
 0x117   :  { %226 = vst.msk [vmem:[%s2397_s3] sm:$0x3] %vm18_vm0, %v224_v0  ;;  %1463 = vmatmul.mubr.msk.f32.vlgmr.msra.gmra.mrb[2].mxu0 %vm47_vm2, %v224_v0  ;;  %1612 = vmatmul.mubr.msk.f32.vlgmr.msra.gmra.mrb[2].mxu1 %vm47_vm2, %v224_v0 }
 0x118   :  { %1787 = vmatpush1.bf16.msra.mxu0 %v2084_v9  ;;  %1802 = vmatpush3.bf16.msra.mxu1 %v2125_v23 }
 0x119   :  { %1789 = vmatprep.subr.bf16.mxu0 %v2086_v10  ;;  %1803 = vmatprep.subr.bf16.mxu1 %v2036_v4 }
 0x11a   :  { %471 = vmatprep.mubr.f32.mxu0 %v2035_v3  ;;  %1630 = vmatprep.mubr.msk.f32.mxu1 %vm2037_vm1, %v2035_v3 }
 0x11c   :  { %1791 = vmatpush1.bf16.msra.mxu0 %v2102_v15  ;;  %1805 = vmatpush3.bf16.msra.mxu1 %v2140_v28 }
 0x11d   :  { %1793 = vmatprep.subr.bf16.mxu0 %v2111_v18  ;;  %1806 = vmatprep.subr.bf16.mxu1 %v2036_v4 }
 0x120   :  { %1795 = vmatpush1.bf16.msra.mxu0 %v2134_v26  ;;  %1808 = vmatpush3.bf16.msra.mxu1 %v2159_v34 }
 0x121   :  { %1797 = vmatprep.subr.bf16.mxu0 %v2143_v29  ;;  %1809 = vmatprep.subr.bf16.mxu1 %v2036_v4 }
 0x124   :  { %1799 = vmatpush1.bf16.msra.mxu0 %v2156_v33  ;;  %1811 = vmatpush3.bf16.msra.mxu1 %v2171_v38 }
 0x125   :  { %1813 = vmatprep.subr.bf16.mxu0 %v2071_v5  ;;  %1828 = vmatprep.subr.bf16.mxu1 %v2036_v4 }
 0x1ea   :  { %v298_v2 = vpop.f32.mrb[2].mxu0  ;;  %v369_v6 = vpop.f32.mrb[2].mxu1 }
 0x1eb   :  { %v373_v8 = vadd.f32 %v1462_v1, %v298_v2  ;;  %v300_v11 = vpop.f32.mrb[3].mxu0  ;;  %v1613_v12 = vpop.f32.mrb[3].mxu1  ;;  %v390_v24 = vadd.f32 %v2204_v52, %v369_v6  ;;  %v1474_v2 = vld [vmem:[%s2395_s0 + $0x12] sm:$0x3f] }
 0x1ec   :  { %v383_v14 = vadd.f32 %v381_v7, %v300_v11 }
 0x1ed   :  { %v1465_v13 = vmul.f32 -1.442695, %v373_v8  ;;  %v731_v8 = vrot.slane %v1474_v2, 2 }
 0x1ee   :  { %v1466_v16 = vmul.f32 -1.442695, %v383_v14 }
 0x1ef   :  { %1965 = vpow2.f32 %v1465_v13 }
 0x1f0   :  { %1967 = vpow2.f32 %v1466_v16 }
 0x1f9   :  { %v1966_v17 = vpop.eup %1965 }
 0x1fa   :  { %v377_v19 = vadd.f32 1.0, %v1966_v17  ;;  %v1968_v20 = vpop.eup %1967 }
 0x1fb   :  { %v387_v21 = vadd.f32 1.0, %v1968_v20 }
 0x1fc   :  { %1969 = vrcp.f32 %v377_v19 }
 0x1fd   :  { %1971 = vrcp.f32 %v387_v21 }
 0x206   :  { %v1970_v25 = vpop.eup %1969 }
 0x207   :  { %v391_v27 = vmul.f32 %v1970_v25, %v390_v24  ;;  %v1972_v31 = vpop.eup %1971  ;;  %v742_v24 = vrot.slane %v1474_v2, 4 }
 0x208   :  { %v396_v32 = vsub.f32 1.0, %v1972_v31  ;;  %v398_v37 = vmul.f32 %v1972_v31, %v224_v0 }
 0x209   :  { %v394_v30 = vadd.f32 %v392_v22, %v391_v27 }
 0x20b   :  { %1973 = vtanh.f32 %v394_v30 }
 0x215   :  { %v1974_v35 = vpop.eup %1973 }
 0x216   :  { %v397_v36 = vmul.f32 %v1974_v35, %v396_v32 }
 0x218   :  { %v399_v39 = vadd.f32 %v398_v37, %v397_v36 }
 0x21a   :  { %1467 = vst.msk [vmem:[%s2397_s3 + $0x2] sm:$0x3] %vm18_vm0, %v399_v39  ;;  %1469 = vmatmul.mubr.msk.f32.vlgmr.msra.gmra.mrb[4].mxu0 %vm47_vm2, %v399_v39  ;;  %1631 = vmatmul.mubr.msk.f32.vlgmr.msra.gmra.mrb[4].mxu1 %vm47_vm2, %v399_v39 }
 0x21b   :  { %1815 = vmatpush1.bf16.msra.mxu0 %v2084_v9  ;;  %1830 = vmatpush3.bf16.msra.mxu1 %v2125_v23 }
 0x21c   :  { %1817 = vmatprep.subr.bf16.mxu0 %v2086_v10  ;;  %1831 = vmatprep.subr.bf16.mxu1 %v2036_v4 }
 0x21d   :  { %646 = vmatprep.mubr.f32.mxu0 %v2035_v3  ;;  %1649 = vmatprep.mubr.msk.f32.mxu1 %vm2037_vm1, %v2035_v3 }
 0x21f   :  { %1819 = vmatpush1.bf16.msra.mxu0 %v2102_v15  ;;  %1833 = vmatpush3.bf16.msra.mxu1 %v2140_v28 }
 0x220   :  { %1821 = vmatprep.subr.bf16.mxu0 %v2111_v18  ;;  %1834 = vmatprep.subr.bf16.mxu1 %v2036_v4 }
 0x223   :  { %1823 = vmatpush1.bf16.msra.mxu0 %v2134_v26  ;;  %1836 = vmatpush3.bf16.msra.mxu1 %v2159_v34 }
 0x224   :  { %1825 = vmatprep.subr.bf16.mxu0 %v2143_v29  ;;  %1837 = vmatprep.subr.bf16.mxu1 %v2036_v4 }
 0x227   :  { %1827 = vmatpush1.bf16.msra.mxu0 %v2156_v33  ;;  %1839 = vmatpush3.bf16.msra.mxu1 %v2171_v38 }
 0x228   :  { %1841 = vmatprep.subr.bf16.mxu0 %v2071_v5  ;;  %1856 = vmatprep.subr.bf16.mxu1 %v2036_v4 }
 0x2ed   :  { %v473_v41 = vpop.f32.mrb[4].mxu0  ;;  %v544_v42 = vpop.f32.mrb[4].mxu1 }
 0x2ee   :  { %v548_v44 = vadd.f32 %v1468_v40, %v473_v41  ;;  %v475_v45 = vpop.f32.mrb[5].mxu0  ;;  %v1632_v46 = vpop.f32.mrb[5].mxu1  ;;  %v565_v56 = vadd.f32 %v2204_v52, %v544_v42  ;;  %v1480_v41 = vld [vmem:[%s2395_s0 + $0x18] sm:$0x3f] }
 0x2ef   :  { %v558_v48 = vadd.f32 %v556_v43, %v475_v45 }
 0x2f0   :  { %v1471_v47 = vmul.f32 -1.442695, %v548_v44  ;;  %v906_v44 = vrot.slane %v1480_v41, 2 }
 0x2f1   :  { %v1472_v49 = vmul.f32 -1.442695, %v558_v48 }
 0x2f2   :  { %1975 = vpow2.f32 %v1471_v47 }
 0x2f3   :  { %1977 = vpow2.f32 %v1472_v49 }
 0x2fc   :  { %v1976_v50 = vpop.eup %1975 }
 0x2fd   :  { %v552_v51 = vadd.f32 1.0, %v1976_v50  ;;  %v1978_v53 = vpop.eup %1977 }
 0x2fe   :  { %v562_v54 = vadd.f32 1.0, %v1978_v53 }
 0x2ff   :  { %1979 = vrcp.f32 %v552_v51 }
 0x300   :  { %1981 = vrcp.f32 %v562_v54 }
 0x309   :  { %v1980_v57 = vpop.eup %1979 }
 0x30a   :  { %v566_v58 = vmul.f32 %v1980_v57, %v565_v56  ;;  %v1982_v60 = vpop.eup %1981  ;;  %v917_v56 = vrot.slane %v1480_v41, 4 }
 0x30b   :  { %v571_v61 = vsub.f32 1.0, %v1982_v60  ;;  %v573_v0 = vmul.f32 %v1982_v60, %v399_v39 }
 0x30c   :  { %v569_v59 = vadd.f32 %v567_v55, %v566_v58 }
 0x30e   :  { %1983 = vtanh.f32 %v569_v59 }
 0x318   :  { %v1984_v62 = vpop.eup %1983 }
 0x319   :  { %v572_v63 = vmul.f32 %v1984_v62, %v571_v61 }
 0x31b   :  { %v574_v1 = vadd.f32 %v573_v0, %v572_v63 }
 0x31d   :  { %1473 = vst.msk [vmem:[%s2397_s3 + $0x4] sm:$0x3] %vm18_vm0, %v574_v1  ;;  %1475 = vmatmul.mubr.msk.f32.vlgmr.msra.gmra.mrb[6].mxu0 %vm47_vm2, %v574_v1  ;;  %1650 = vmatmul.mubr.msk.f32.vlgmr.msra.gmra.mrb[6].mxu1 %vm47_vm2, %v574_v1 }
 0x31e   :  { %1843 = vmatpush1.bf16.msra.mxu0 %v2084_v9  ;;  %1858 = vmatpush3.bf16.msra.mxu1 %v2125_v23 }
 0x31f   :  { %1845 = vmatprep.subr.bf16.mxu0 %v2086_v10  ;;  %1859 = vmatprep.subr.bf16.mxu1 %v2036_v4 }
 0x320   :  { %821 = vmatprep.mubr.f32.mxu0 %v2035_v3  ;;  %1668 = vmatprep.mubr.msk.f32.mxu1 %vm2037_vm1, %v2035_v3 }
 0x322   :  { %1847 = vmatpush1.bf16.msra.mxu0 %v2102_v15  ;;  %1861 = vmatpush3.bf16.msra.mxu1 %v2140_v28 }
 0x323   :  { %1849 = vmatprep.subr.bf16.mxu0 %v2111_v18  ;;  %1862 = vmatprep.subr.bf16.mxu1 %v2036_v4 }
 0x326   :  { %1851 = vmatpush1.bf16.msra.mxu0 %v2134_v26  ;;  %1864 = vmatpush3.bf16.msra.mxu1 %v2159_v34 }
 0x327   :  { %1853 = vmatprep.subr.bf16.mxu0 %v2143_v29  ;;  %1865 = vmatprep.subr.bf16.mxu1 %v2036_v4 }
 0x32a   :  { %1855 = vmatpush1.bf16.msra.mxu0 %v2156_v33  ;;  %1867 = vmatpush3.bf16.msra.mxu1 %v2171_v38 }
 0x32b   :  { %1869 = vmatprep.subr.bf16.mxu0 %v2071_v5  ;;  %1884 = vmatprep.subr.bf16.mxu1 %v2036_v4 }
 0x3f0   :  { %v648_v6 = vpop.f32.mrb[6].mxu0  ;;  %v719_v7 = vpop.f32.mrb[6].mxu1 }
 0x3f1   :  { %v723_v11 = vadd.f32 %v1474_v2, %v648_v6  ;;  %v650_v12 = vpop.f32.mrb[7].mxu0  ;;  %v1651_v13 = vpop.f32.mrb[7].mxu1  ;;  %v740_v25 = vadd.f32 %v2204_v52, %v719_v7  ;;  %v1486_v6 = vld [vmem:[%s2395_s0 + $0x1e] sm:$0x3f] }
 0x3f2   :  { %v733_v16 = vadd.f32 %v731_v8, %v650_v12 }
 0x3f3   :  { %v1477_v14 = vmul.f32 -1.442695, %v723_v11  ;;  %v1081_v11 = vrot.slane %v1486_v6, 2 }
 0x3f4   :  { %v1478_v17 = vmul.f32 -1.442695, %v733_v16 }
 0x3f5   :  { %1985 = vpow2.f32 %v1477_v14 }
 0x3f6   :  { %1987 = vpow2.f32 %v1478_v17 }
 0x3ff   :  { %v1986_v19 = vpop.eup %1985 }
 0x400   :  { %v727_v20 = vadd.f32 1.0, %v1986_v19  ;;  %v1988_v21 = vpop.eup %1987 }
 0x401   :  { %v737_v22 = vadd.f32 1.0, %v1988_v21 }
 0x402   :  { %1989 = vrcp.f32 %v727_v20 }
 0x403   :  { %1991 = vrcp.f32 %v737_v22 }
 0x40c   :  { %v1990_v27 = vpop.eup %1989 }
 0x40d   :  { %v741_v30 = vmul.f32 %v1990_v27, %v740_v25  ;;  %v1992_v32 = vpop.eup %1991 }
 0x40e   :  { %v746_v35 = vsub.f32 1.0, %v1992_v32  ;;  %v748_v39 = vmul.f32 %v1992_v32, %v574_v1 }
 0x40f   :  { %v744_v31 = vadd.f32 %v742_v24, %v741_v30  ;;  %v1092_v24 = vrot.slane %v1486_v6, 4 }
 0x411   :  { %1993 = vtanh.f32 %v744_v31 }
 0x41b   :  { %v1994_v36 = vpop.eup %1993 }
 0x41c   :  { %v747_v37 = vmul.f32 %v1994_v36, %v746_v35 }
 0x41e   :  { %v749_v40 = vadd.f32 %v748_v39, %v747_v37 }
 0x420   :  { %1479 = vst.msk [vmem:[%s2397_s3 + $0x6] sm:$0x3] %vm18_vm0, %v749_v40  ;;  %1481 = vmatmul.mubr.msk.f32.vlgmr.msra.gmra.mrb[8].mxu0 %vm47_vm2, %v749_v40  ;;  %1669 = vmatmul.mubr.msk.f32.vlgmr.msra.gmra.mrb[8].mxu1 %vm47_vm2, %v749_v40 }
 0x421   :  { %1871 = vmatpush1.bf16.msra.mxu0 %v2084_v9  ;;  %1886 = vmatpush3.bf16.msra.mxu1 %v2125_v23 }
 0x422   :  { %1873 = vmatprep.subr.bf16.mxu0 %v2086_v10  ;;  %1887 = vmatprep.subr.bf16.mxu1 %v2036_v4 }
 0x423   :  { %996 = vmatprep.mubr.f32.mxu0 %v2035_v3  ;;  %1687 = vmatprep.mubr.msk.f32.mxu1 %vm2037_vm1, %v2035_v3 }
 0x425   :  { %1875 = vmatpush1.bf16.msra.mxu0 %v2102_v15  ;;  %1889 = vmatpush3.bf16.msra.mxu1 %v2140_v28 }
 0x426   :  { %1877 = vmatprep.subr.bf16.mxu0 %v2111_v18  ;;  %1890 = vmatprep.subr.bf16.mxu1 %v2036_v4 }
 0x429   :  { %1879 = vmatpush1.bf16.msra.mxu0 %v2134_v26  ;;  %1892 = vmatpush3.bf16.msra.mxu1 %v2159_v34 }
 0x42a   :  { %1881 = vmatprep.subr.bf16.mxu0 %v2143_v29  ;;  %1893 = vmatprep.subr.bf16.mxu1 %v2036_v4 }
 0x42d   :  { %1883 = vmatpush1.bf16.msra.mxu0 %v2156_v33  ;;  %1895 = vmatpush3.bf16.msra.mxu1 %v2171_v38 }
 0x42e   :  { %1897 = vmatprep.subr.bf16.mxu0 %v2071_v5  ;;  %1912 = vmatprep.subr.bf16.mxu1 %v2036_v4 }
 0x4f3   :  { %v823_v42 = vpop.f32.mrb[8].mxu0  ;;  %v894_v43 = vpop.f32.mrb[8].mxu1 }
 0x4f4   :  { %v898_v45 = vadd.f32 %v1480_v41, %v823_v42  ;;  %v825_v46 = vpop.f32.mrb[9].mxu0  ;;  %v1670_v47 = vpop.f32.mrb[9].mxu1  ;;  %v915_v57 = vadd.f32 %v2204_v52, %v894_v43 }
 0x4f5   :  { %v908_v49 = vadd.f32 %v906_v44, %v825_v46 }
 0x4f6   :  { %v1483_v48 = vmul.f32 -1.442695, %v898_v45 }
 0x4f7   :  { %v1484_v50 = vmul.f32 -1.442695, %v908_v49 }
 0x4f8   :  { %1995 = vpow2.f32 %v1483_v48 }
 0x4f9   :  { %1997 = vpow2.f32 %v1484_v50 }
 0x502   :  { %v1996_v51 = vpop.eup %1995 }
 0x503   :  { %v902_v53 = vadd.f32 1.0, %v1996_v51  ;;  %v1998_v54 = vpop.eup %1997 }
 0x504   :  { %v912_v55 = vadd.f32 1.0, %v1998_v54  ;;  %v1498_v54 = vld [vmem:[%s2395_s0 + $0x2a] sm:$0x3f] }
 0x505   :  { %1999 = vrcp.f32 %v902_v53 }
 0x506   :  { %2001 = vrcp.f32 %v912_v55 }
 0x50f   :  { %v2000_v58 = vpop.eup %1999 }
 0x510   :  { %v916_v59 = vmul.f32 %v2000_v58, %v915_v57  ;;  %v2002_v61 = vpop.eup %2001  ;;  %v1431_v57 = vrot.slane %v1498_v54, 2 }
 0x511   :  { %v921_v62 = vsub.f32 1.0, %v2002_v61  ;;  %v923_v1 = vmul.f32 %v2002_v61, %v749_v40 }
 0x512   :  { %v919_v60 = vadd.f32 %v917_v56, %v916_v59 }
 0x514   :  { %2003 = vtanh.f32 %v919_v60 }
 0x51e   :  { %v2004_v63 = vpop.eup %2003 }
 0x51f   :  { %v922_v0 = vmul.f32 %v2004_v63, %v921_v62 }
 0x521   :  { %v924_v2 = vadd.f32 %v923_v1, %v922_v0 }
 0x523   :  { %1485 = vst.msk [vmem:[%s2397_s3 + $0x8] sm:$0x3] %vm18_vm0, %v924_v2  ;;  %1487 = vmatmul.mubr.msk.f32.vlgmr.msra.gmra.mrb[10].mxu0 %vm47_vm2, %v924_v2  ;;  %1688 = vmatmul.mubr.msk.f32.vlgmr.msra.gmra.mrb[10].mxu1 %vm47_vm2, %v924_v2 }
 0x524   :  { %1899 = vmatpush1.bf16.msra.mxu0 %v2084_v9  ;;  %1914 = vmatpush3.bf16.msra.mxu1 %v2125_v23 }
 0x525   :  { %1901 = vmatprep.subr.bf16.mxu0 %v2086_v10  ;;  %1915 = vmatprep.subr.bf16.mxu1 %v2036_v4 }
 0x526   :  { %1171 = vmatprep.mubr.f32.mxu0 %v2035_v3  ;;  %1706 = vmatprep.mubr.msk.f32.mxu1 %vm2037_vm1, %v2035_v3 }
 0x528   :  { %1903 = vmatpush1.bf16.msra.mxu0 %v2102_v15  ;;  %1917 = vmatpush3.bf16.msra.mxu1 %v2140_v28 }
 0x529   :  { %1905 = vmatprep.subr.bf16.mxu0 %v2111_v18  ;;  %1918 = vmatprep.subr.bf16.mxu1 %v2036_v4 }
 0x52c   :  { %1907 = vmatpush1.bf16.msra.mxu0 %v2134_v26  ;;  %1920 = vmatpush3.bf16.msra.mxu1 %v2159_v34 }
 0x52d   :  { %1909 = vmatprep.subr.bf16.mxu0 %v2143_v29  ;;  %1921 = vmatprep.subr.bf16.mxu1 %v2036_v4 }
 0x530   :  { %1911 = vmatpush1.bf16.msra.mxu0 %v2156_v33  ;;  %1923 = vmatpush3.bf16.msra.mxu1 %v2171_v38 }
 0x531   :  { %1925 = vmatprep.subr.bf16.mxu0 %v2071_v5  ;;  %1940 = vmatprep.subr.bf16.mxu1 %v2036_v4 }
 0x5f6   :  { %v998_v7 = vpop.f32.mrb[10].mxu0  ;;  %v1069_v8 = vpop.f32.mrb[10].mxu1 }
 0x5f7   :  { %v1073_v12 = vadd.f32 %v1486_v6, %v998_v7  ;;  %v1000_v13 = vpop.f32.mrb[11].mxu0  ;;  %v1689_v14 = vpop.f32.mrb[11].mxu1  ;;  %v1090_v25 = vadd.f32 %v2204_v52, %v1069_v8  ;;  %v1442_v7 = vrot.slane %v1498_v54, 4 }
 0x5f8   :  { %v1083_v17 = vadd.f32 %v1081_v11, %v1000_v13 }
 0x5f9   :  { %v1489_v16 = vmul.f32 -1.442695, %v1073_v12 }
 0x5fa   :  { %v1490_v19 = vmul.f32 -1.442695, %v1083_v17 }
 0x5fb   :  { %2005 = vpow2.f32 %v1489_v16 }
 0x5fc   :  { %2007 = vpow2.f32 %v1490_v19 }
 0x605   :  { %v2006_v20 = vpop.eup %2005 }
 0x606   :  { %v1077_v21 = vadd.f32 1.0, %v2006_v20  ;;  %v2008_v5 = vpop.eup %2007 }
 0x607   :  { %v1087_v22 = vadd.f32 1.0, %v2008_v5 }
 0x608   :  { %2009 = vrcp.f32 %v1077_v21 }
 0x609   :  { %2011 = vrcp.f32 %v1087_v22 }
 0x612   :  { %v2010_v27 = vpop.eup %2009 }
 0x613   :  { %v1091_v30 = vmul.f32 %v2010_v27, %v1090_v25  ;;  %v2012_v32 = vpop.eup %2011 }
 0x614   :  { %v1096_v35 = vsub.f32 1.0, %v2012_v32  ;;  %v1098_v39 = vmul.f32 %v2012_v32, %v924_v2 }
 0x615   :  { %v1094_v31 = vadd.f32 %v1092_v24, %v1091_v30 }
 0x617   :  { %2013 = vtanh.f32 %v1094_v31 }
 0x621   :  { %v2014_v36 = vpop.eup %2013 }
 0x622   :  { %v1097_v37 = vmul.f32 %v2014_v36, %v1096_v35 }
 0x624   :  { %v1099_v40 = vadd.f32 %v1098_v39, %v1097_v37 }
 0x626   :  { %1491 = vst.msk [vmem:[%s2397_s3 + $0xa] sm:$0x3] %vm18_vm0, %v1099_v40  ;;  %1493 = vmatmul.mubr.msk.f32.vlgmr.msra.gmra.mrb[12].mxu0 %vm47_vm2, %v1099_v40  ;;  %1707 = vmatmul.mubr.msk.f32.vlgmr.msra.gmra.mrb[12].mxu1 %vm47_vm2, %v1099_v40 }
 0x627   :  { %1927 = vmatpush1.bf16.msra.mxu0 %v2084_v9  ;;  %1942 = vmatpush3.bf16.msra.mxu1 %v2125_v23 }
 0x628   :  { %1929 = vmatprep.subr.bf16.mxu0 %v2086_v10  ;;  %1943 = vmatprep.subr.bf16.mxu1 %v2036_v4 }
 0x629   :  { %1346 = vmatprep.mubr.f32.mxu0 %v2035_v3  ;;  %1725 = vmatprep.mubr.msk.f32.mxu1 %vm2037_vm1, %v2035_v3  ;;  %v1492_v3 = vld [vmem:[%s2395_s0 + $0x24] sm:$0x3f] }
 0x62a   :  { %v1267_v42 = vrot.slane %v1492_v3, 4 }
 0x62b   :  { %1931 = vmatpush1.bf16.msra.mxu0 %v2102_v15  ;;  %1945 = vmatpush3.bf16.msra.mxu1 %v2140_v28  ;;  %v1256_v15 = vrot.slane %v1492_v3, 2 }
 0x62c   :  { %1933 = vmatprep.subr.bf16.mxu0 %v2111_v18  ;;  %1946 = vmatprep.subr.bf16.mxu1 %v2036_v4 }
 0x62f   :  { %1935 = vmatpush1.bf16.msra.mxu0 %v2134_v26  ;;  %1948 = vmatpush3.bf16.msra.mxu1 %v2159_v34 }
 0x630   :  { %1937 = vmatprep.subr.bf16.mxu0 %v2143_v29  ;;  %1949 = vmatprep.subr.bf16.mxu1 %v2036_v4 }
 0x633   :  { %1939 = vmatpush1.bf16.msra.mxu0 %v2156_v33  ;;  %1951 = vmatpush3.bf16.msra.mxu1 %v2171_v38 }
 0x6f9   :  { %v1173_v9 = vpop.f32.mrb[12].mxu0  ;;  %v1244_v10 = vpop.f32.mrb[12].mxu1 }
 0x6fa   :  { %v1248_v18 = vadd.f32 %v1492_v3, %v1173_v9  ;;  %v1175_v23 = vpop.f32.mrb[13].mxu0  ;;  %v1708_v26 = vpop.f32.mrb[13].mxu1  ;;  %v1265_v43 = vadd.f32 %v2204_v52, %v1244_v10 }
 0x6fb   :  { %v1258_v34 = vadd.f32 %v1256_v15, %v1175_v23 }
 0x6fc   :  { %v1495_v28 = vmul.f32 -1.442695, %v1248_v18 }
 0x6fd   :  { %v1496_v29 = vmul.f32 -1.442695, %v1258_v34 }
 0x6fe   :  { %2015 = vpow2.f32 %v1495_v28 }
 0x6ff   :  { %2017 = vpow2.f32 %v1496_v29 }
 0x708   :  { %v2016_v4 = vpop.eup %2015 }
 0x709   :  { %v1252_v41 = vadd.f32 1.0, %v2016_v4  ;;  %v2018_v33 = vpop.eup %2017 }
 0x70a   :  { %v1262_v38 = vadd.f32 1.0, %v2018_v33 }
 0x70b   :  { %2019 = vrcp.f32 %v1252_v41 }
 0x70c   :  { %2021 = vrcp.f32 %v1262_v38 }
 0x715   :  { %v2020_v44 = vpop.eup %2019 }
 0x716   :  { %v1266_v45 = vmul.f32 %v2020_v44, %v1265_v43  ;;  %v2022_v47 = vpop.eup %2021 }
 0x717   :  { %v1271_v48 = vsub.f32 1.0, %v2022_v47  ;;  %v1273_v51 = vmul.f32 %v2022_v47, %v1099_v40 }
 0x718   :  { %v1269_v46 = vadd.f32 %v1267_v42, %v1266_v45 }
 0x71a   :  { %2023 = vtanh.f32 %v1269_v46 }
 0x724   :  { %v2024_v49 = vpop.eup %2023 }
 0x725   :  { %v1272_v50 = vmul.f32 %v2024_v49, %v1271_v48 }
 0x727   :  { %v1274_v53 = vadd.f32 %v1273_v51, %v1272_v50 }
 0x729   :  { %1497 = vst.msk [vmem:[%s2397_s3 + $0xc] sm:$0x3] %vm18_vm0, %v1274_v53  ;;  %1499 = vmatmul.mubr.msk.f32.vlgmr.msra.gmra.mrb[14].mxu0 %vm47_vm2, %v1274_v53  ;;  %1726 = vmatmul.mubr.msk.f32.vlgmr.msra.gmra.mrb[14].mxu1 %vm47_vm2, %v1274_v53 }
 0x7fc   :  { %v1348_v55 = vpop.f32.mrb[14].mxu0  ;;  %v1419_v56 = vpop.f32.mrb[14].mxu1 }
 0x7fd   :  { %v1423_v58 = vadd.f32 %v1498_v54, %v1348_v55  ;;  %v1350_v59 = vpop.f32.mrb[15].mxu0  ;;  %v1727_v60 = vpop.f32.mrb[15].mxu1  ;;  %v1440_v8 = vadd.f32 %v2204_v52, %v1419_v56 }
 0x7fe   :  { %v1433_v62 = vadd.f32 %v1431_v57, %v1350_v59 }
 0x7ff   :  { %v1501_v61 = vmul.f32 -1.442695, %v1423_v58 }
 0x800   :  { %v1502_v63 = vmul.f32 -1.442695, %v1433_v62 }
 0x801   :  { %2025 = vpow2.f32 %v1501_v61 }
 0x802   :  { %2027 = vpow2.f32 %v1502_v63 }
 0x80b   :  { %v2026_v0 = vpop.eup %2025 }
 0x80c   :  { %v1427_v1 = vadd.f32 1.0, %v2026_v0  ;;  %v2028_v2 = vpop.eup %2027 }
 0x80d   :  { %v1437_v6 = vadd.f32 1.0, %v2028_v2 }
 0x80e   :  { %2029 = vrcp.f32 %v1427_v1 }
 0x80f   :  { %2031 = vrcp.f32 %v1437_v6 }
 0x818   :  { %v2030_v11 = vpop.eup %2029 }
 0x819   :  { %v1441_v12 = vmul.f32 %v2030_v11, %v1440_v8  ;;  %v2032_v14 = vpop.eup %2031 }
 0x81a   :  { %v1446_v16 = vsub.f32 1.0, %v2032_v14  ;;  %v1448_v20 = vmul.f32 %v2032_v14, %v1274_v53 }
 0x81b   :  { %v1444_v13 = vadd.f32 %v1442_v7, %v1441_v12 }
 0x81d   :  { %2033 = vtanh.f32 %v1444_v13 }
 0x827   :  { %v2034_v17 = vpop.eup %2033 }
 0x828   :  { %v1447_v19 = vmul.f32 %v2034_v17, %v1446_v16 }
 0x82a   :  { %v1449_v21 = vadd.f32 %v1448_v20, %v1447_v19 }
 0x82c   :  { %1503 = vst.msk [vmem:[%s2397_s3 + $0xe] sm:$0x3] %vm18_vm0, %v1449_v21  ;;  %1452 = vst.msk [vmem:[#allocation2] sm:$0x3] %vm18_vm0, %v1449_v21 }

</bundles_post_ra>
